<compile_context>
chip_gen: v7x
topology: tpu7x:2x2x1
jax: 0.10.0
libtpu: 0.0.40
codegen_flags: <defaults>
</compile_context>

<pallas_src>
import functools

import jax
import jax.numpy as jnp
from jax.experimental import pallas as pl
from jax.experimental.pallas import tpu as pltpu


LANE = 128      # feature dims padded to multiples of 128 (lane width)
SUBLANE = 8     # batch tile padded to multiples of 8 (sublane width)


def _round_up(x, m):
    return ((x + m - 1) // m) * m


def _pad_to(a, shape):
    pads = [(0, t - s) for s, t in zip(a.shape, shape)]
    return jnp.pad(a, pads)


def encoder_kernel(x_ref, w1_ref, b1_ref, w2_ref, b2_ref, w3_ref, b3_ref, o_ref):
    """Fused 3-layer MLP on one batch tile: (Linear + ReLU) x 3.

    x / weight refs are bf16 (MXU operands); bias refs and the output are
    f32; accumulation and the elementwise bias+ReLU path stay in f32.
    """
    h = x_ref[...]                                                     # bf16 (TB, D0p)

    a1 = jnp.dot(h, w1_ref[...], preferred_element_type=jnp.float32)  # f32 (TB, D1p)
    h1 = jnp.maximum(a1 + b1_ref[...], 0.0)

    a2 = jnp.dot(h1.astype(jnp.bfloat16), w2_ref[...],
                 preferred_element_type=jnp.float32)                   # f32 (TB, D2p)
    h2 = jnp.maximum(a2 + b2_ref[...], 0.0)

    a3 = jnp.dot(h2.astype(jnp.bfloat16), w3_ref[...],
                 preferred_element_type=jnp.float32)                   # f32 (TB, Dzp)
    h3 = jnp.maximum(a3 + b3_ref[...], 0.0)

    o_ref[...] = h3                                                    # lane-dense f32 store


@functools.partial(jax.jit, static_argnames=("block_batch",))
def encoder_forward(x, params, *, block_batch=512):
    """params = [(w1, b1), (w2, b2), (w3, b3)], w: [in, out], b: [1, out] (f32)."""
    (w1, b1), (w2, b2), (w3, b3) = params
    B, D0 = x.shape
    D1, D2, Dz = w1.shape[1], w2.shape[1], w3.shape[1]

    # Padded (lane-dense) dims.
    D0p, D1p, D2p, Dzp = (_round_up(d, LANE) for d in (D0, D1, D2, Dz))

    # Batch tile: big enough to fill the MXU at large batch, but never larger
    # than the (sublane-rounded) batch itself for tiny inputs.
    TB = min(block_batch, _round_up(B, SUBLANE))
    Bp = _round_up(B, TB)

    # Pad + cast MXU operands to bf16; biases stay f32 (bias/ReLU path is f32).
    xp = _pad_to(x, (Bp, D0p)).astype(jnp.bfloat16)
    w1p = _pad_to(w1, (D0p, D1p)).astype(jnp.bfloat16)
    w2p = _pad_to(w2, (D1p, D2p)).astype(jnp.bfloat16)
    w3p = _pad_to(w3, (D2p, Dzp)).astype(jnp.bfloat16)
    b1p = _pad_to(b1, (1, D1p))
    b2p = _pad_to(b2, (1, D2p))
    b3p = _pad_to(b3, (1, Dzp))

    def resident_spec(shape):
        # Weight/bias block is the whole array and does not move with the grid
        # index -> stays resident in VMEM across all batch tiles.
        return pl.BlockSpec(shape, lambda i, _nd=len(shape): (0,) * _nd)

    # Generous VMEM limit so resident weights + double-buffered x/out tiles
    # fit even for the default Encoder dims (1024/512/256).
    vmem_bytes = min(
        96 * 1024 * 1024,
        2 * (2 * TB * (D0p + Dzp) * 4)
        + 2 * (D0p * D1p + D1p * D2p + D2p * Dzp)
        + 4 * (D1p + D2p + Dzp)
        + (2 << 20),
    )

    out_padded = pl.pallas_call(
        encoder_kernel,
        out_shape=jax.ShapeDtypeStruct((Bp, Dzp), jnp.float32),
        grid=(Bp // TB,),
        in_specs=[
            pl.BlockSpec((TB, D0p), lambda i: (i, 0)),     # x: tiled over batch
            resident_spec(w1p.shape), resident_spec(b1p.shape),
            resident_spec(w2p.shape), resident_spec(b2p.shape),
            resident_spec(w3p.shape), resident_spec(b3p.shape),
        ],
        out_specs=pl.BlockSpec((TB, Dzp), lambda i: (i, 0)),
        compiler_params=pltpu.CompilerParams(
            dimension_semantics=("parallel",),             # megacore sharding on v7x
            vmem_limit_bytes=vmem_bytes,
        ),
    )(xp, w1p, b1p, w2p, b2p, w3p, b3p)

    # Slice the lane-dense padded slab back to logical shape.
    return out_padded[:B, :Dz]


def init_linear_params(key, in_dim, out_dim):
    """Deterministic init mimicking PyTorch nn.Linear default (uniform +-1/sqrt(in))."""
    kw, kb = jax.random.split(key)
    bound = 1.0 / (in_dim ** 0.5)
    w = jax.random.uniform(kw, (in_dim, out_dim), jnp.float32, -bound, bound)
    b = jax.random.uniform(kb, (1, out_dim), jnp.float32, -bound, bound)
    return w, b


def reference_forward(x, params):
    """Pure-JAX reference with the same bf16-operand / f32-accumulate matmuls."""
    h = x
    for w, b in params:
        a = jnp.dot(h.astype(jnp.bfloat16), w.astype(jnp.bfloat16),
                    preferred_element_type=jnp.float32)
        h = jnp.maximum(a + b, 0.0)
    return h


if __name__ == "__main__":
    # Small shapes consistent with the module's forward: x is [batch, input_dim].
    batch, input_dim = 8, 32
    h_dim = [64, 48]
    z_dim = 16

    key = jax.random.PRNGKey(0)
    kx, k1, k2, k3 = jax.random.split(key, 4)

    x = jax.random.normal(kx, (batch, input_dim), jnp.float32)

    params = [
        init_linear_params(k1, input_dim, h_dim[0]),
        init_linear_params(k2, h_dim[0], h_dim[1]),
        init_linear_params(k3, h_dim[1], z_dim),
    ]

    out = encoder_forward(x, params)
    out = jax.block_until_ready(out)

    ref = reference_forward(x, params)
    assert out.shape == (batch, z_dim), out.shape
    assert jnp.allclose(out, ref, atol=1e-3, rtol=1e-3), "mismatch vs. pure-JAX reference"

    # Also sanity-check against the full-f32 reference (bf16 rounding tolerance).
    ref_f32 = x
    for w, b in params:
        ref_f32 = jnp.maximum(ref_f32 @ w + b, 0.0)
    assert jnp.allclose(out, ref_f32, atol=5e-2, rtol=5e-2), "bf16 drift too large"

    print("KERNEL_OK")
</pallas_src>

<mosaic_0001>
module attributes {stable_mosaic.version = 11 : i64} {
  func.func @encoder_kernel(%arg0: i32, %arg1: memref<8x128xbf16, #tpu.memory_space<vmem>>, %arg2: memref<128x128xbf16, #tpu.memory_space<vmem>>, %arg3: memref<1x128xf32, #tpu.memory_space<vmem>>, %arg4: memref<128x128xbf16, #tpu.memory_space<vmem>>, %arg5: memref<1x128xf32, #tpu.memory_space<vmem>>, %arg6: memref<128x128xbf16, #tpu.memory_space<vmem>>, %arg7: memref<1x128xf32, #tpu.memory_space<vmem>>, %arg8: memref<8x128xf32, #tpu.memory_space<vmem>>) attributes {dimension_semantics = [#tpu.dimension_semantics<parallel>], iteration_bounds = array<i64: 1>, scalar_prefetch = 0 : i64, scratch_operands = 0 : i64, tpu.core_type = #tpu.core_type<tc>, window_params = [{transform_indices = @transform_0, window_bounds = array<i64: 8, 128>}, {pipeline_mode = #tpu.pipeline_mode<synchronous>, transform_indices = @transform_1, window_bounds = array<i64: 128, 128>}, {pipeline_mode = #tpu.pipeline_mode<synchronous>, transform_indices = @transform_2, window_bounds = array<i64: 1, 128>}, {pipeline_mode = #tpu.pipeline_mode<synchronous>, transform_indices = @transform_3, window_bounds = array<i64: 128, 128>}, {pipeline_mode = #tpu.pipeline_mode<synchronous>, transform_indices = @transform_4, window_bounds = array<i64: 1, 128>}, {pipeline_mode = #tpu.pipeline_mode<synchronous>, transform_indices = @transform_5, window_bounds = array<i64: 128, 128>}, {pipeline_mode = #tpu.pipeline_mode<synchronous>, transform_indices = @transform_6, window_bounds = array<i64: 1, 128>}, {transform_indices = @transform_7, window_bounds = array<i64: 8, 128>}]} {
    %c0 = arith.constant 0 : index
    %c0_0 = arith.constant 0 : index
    %0 = vector.load %arg1[%c0, %c0_0] : memref<8x128xbf16, #tpu.memory_space<vmem>>, vector<8x128xbf16>
    %c0_1 = arith.constant 0 : index
    %c0_2 = arith.constant 0 : index
    %1 = vector.load %arg2[%c0_1, %c0_2] : memref<128x128xbf16, #tpu.memory_space<vmem>>, vector<128x128xbf16>
    %cst = arith.constant dense<0.000000e+00> : vector<8x128xf32>
    %2 = tpu.matmul %0, %1, %cst {dimension_numbers = #tpu.dot_dimension_numbers<[1], [0], [0], [1], [0, 0, 1, 1], [], []>} : vector<8x128xbf16>, vector<128x128xbf16>, vector<8x128xf32> -> vector<8x128xf32>
    %c0_3 = arith.constant 0 : index
    %c0_4 = arith.constant 0 : index
    %3 = vector.load %arg3[%c0_3, %c0_4] : memref<1x128xf32, #tpu.memory_space<vmem>>, vector<1x128xf32>
    %4 = vector.broadcast %3 : vector<1x128xf32> to vector<8x128xf32>
    %5 = arith.addf %2, %4 : vector<8x128xf32>
    %cst_5 = arith.constant 0.000000e+00 : f32
    %6 = vector.broadcast %cst_5 : f32 to vector<8x128xf32>
    %7 = arith.maximumf %5, %6 : vector<8x128xf32>
    %8 = arith.truncf %7 : vector<8x128xf32> to vector<8x128xbf16>
    %c0_6 = arith.constant 0 : index
    %c0_7 = arith.constant 0 : index
    %9 = vector.load %arg4[%c0_6, %c0_7] : memref<128x128xbf16, #tpu.memory_space<vmem>>, vector<128x128xbf16>
    %cst_8 = arith.constant dense<0.000000e+00> : vector<8x128xf32>
    %10 = tpu.matmul %8, %9, %cst_8 {dimension_numbers = #tpu.dot_dimension_numbers<[1], [0], [0], [1], [0, 0, 1, 1], [], []>} : vector<8x128xbf16>, vector<128x128xbf16>, vector<8x128xf32> -> vector<8x128xf32>
    %c0_9 = arith.constant 0 : index
    %c0_10 = arith.constant 0 : index
    %11 = vector.load %arg5[%c0_9, %c0_10] : memref<1x128xf32, #tpu.memory_space<vmem>>, vector<1x128xf32>
    %12 = vector.broadcast %11 : vector<1x128xf32> to vector<8x128xf32>
    %13 = arith.addf %10, %12 : vector<8x128xf32>
    %cst_11 = arith.constant 0.000000e+00 : f32
    %14 = vector.broadcast %cst_11 : f32 to vector<8x128xf32>
    %15 = arith.maximumf %13, %14 : vector<8x128xf32>
    %16 = arith.truncf %15 : vector<8x128xf32> to vector<8x128xbf16>
    %c0_12 = arith.constant 0 : index
    %c0_13 = arith.constant 0 : index
    %17 = vector.load %arg6[%c0_12, %c0_13] : memref<128x128xbf16, #tpu.memory_space<vmem>>, vector<128x128xbf16>
    %cst_14 = arith.constant dense<0.000000e+00> : vector<8x128xf32>
    %18 = tpu.matmul %16, %17, %cst_14 {dimension_numbers = #tpu.dot_dimension_numbers<[1], [0], [0], [1], [0, 0, 1, 1], [], []>} : vector<8x128xbf16>, vector<128x128xbf16>, vector<8x128xf32> -> vector<8x128xf32>
    %c0_15 = arith.constant 0 : index
    %c0_16 = arith.constant 0 : index
    %19 = vector.load %arg7[%c0_15, %c0_16] : memref<1x128xf32, #tpu.memory_space<vmem>>, vector<1x128xf32>
    %20 = vector.broadcast %19 : vector<1x128xf32> to vector<8x128xf32>
    %21 = arith.addf %18, %20 : vector<8x128xf32>
    %cst_17 = arith.constant 0.000000e+00 : f32
    %22 = vector.broadcast %cst_17 : f32 to vector<8x128xf32>
    %23 = arith.maximumf %21, %22 : vector<8x128xf32>
    %c0_18 = arith.constant 0 : index
    %c0_19 = arith.constant 0 : index
    %24 = vector.load %arg8[%c0_18, %c0_19] : memref<8x128xf32, #tpu.memory_space<vmem>>, vector<8x128xf32>
    tpu.vector_store %arg8[%c0_18, %c0_19], %23 {strides = array<i32>} : memref<8x128xf32, #tpu.memory_space<vmem>>, vector<8x128xf32>,
    return
  }
  func.func @transform_0(%arg0: i32) -> (i32, i32) {
    %c0_i32 = arith.constant 0 : i32
    %c0_i32_0 = arith.constant 0 : i32
    return %arg0, %c0_i32 : i32, i32
  }
  func.func @transform_1(%arg0: i32) -> (i32, i32) {
    %c0_i32 = arith.constant 0 : i32
    %c0_i32_0 = arith.constant 0 : i32
    %c0_i32_1 = arith.constant 0 : i32
    return %c0_i32, %c0_i32_0 : i32, i32
  }
  func.func @transform_2(%arg0: i32) -> (i32, i32) {
    %c0_i32 = arith.constant 0 : i32
    %c0_i32_0 = arith.constant 0 : i32
    %c0_i32_1 = arith.constant 0 : i32
    return %c0_i32, %c0_i32_0 : i32, i32
  }
  func.func @transform_3(%arg0: i32) -> (i32, i32) {
    %c0_i32 = arith.constant 0 : i32
    %c0_i32_0 = arith.constant 0 : i32
    %c0_i32_1 = arith.constant 0 : i32
    return %c0_i32, %c0_i32_0 : i32, i32
  }
  func.func @transform_4(%arg0: i32) -> (i32, i32) {
    %c0_i32 = arith.constant 0 : i32
    %c0_i32_0 = arith.constant 0 : i32
    %c0_i32_1 = arith.constant 0 : i32
    return %c0_i32, %c0_i32_0 : i32, i32
  }
  func.func @transform_5(%arg0: i32) -> (i32, i32) {
    %c0_i32 = arith.constant 0 : i32
    %c0_i32_0 = arith.constant 0 : i32
    %c0_i32_1 = arith.constant 0 : i32
    return %c0_i32, %c0_i32_0 : i32, i32
  }
  func.func @transform_6(%arg0: i32) -> (i32, i32) {
    %c0_i32 = arith.constant 0 : i32
    %c0_i32_0 = arith.constant 0 : i32
    %c0_i32_1 = arith.constant 0 : i32
    return %c0_i32, %c0_i32_0 : i32, i32
  }
  func.func @transform_7(%arg0: i32) -> (i32, i32) {
    %c0_i32 = arith.constant 0 : i32
    %c0_i32_0 = arith.constant 0 : i32
    return %arg0, %c0_i32 : i32, i32
  }
}

</mosaic_0001>

<bundles_post_ra>
// kernel: encoder_forward.1
= control target key start
LH: loop header
LB: loop body
LE: loop exit
PB: predicated region body
PF: predicated region fallthrough
CT: control target
= control target key end

     0   :  { %v547_v1 = vmov 0.0   ;;  %vm548_vm0 = vmmov 0   ;;  %s716_s0 = inlined_call_operand.vmem [shape: bf16[8,128], index: 0, kind: input, shape index: {}]   ;;  %s717_s1 = inlined_call_operand.vmem [shape: bf16[128,128], index: 1, kind: input, shape index: {}]   ;;  %s718_s2 = inlined_call_operand.vmem [shape: f32[1,128], index: 2, kind: input, shape index: {}]   ;;  %s719_s3 = inlined_call_operand.vmem [shape: bf16[128,128], index: 3, kind: input, shape index: {}]   ;;  %s720_s4 = inlined_call_operand.vmem [shape: f32[1,128], index: 4, kind: input, shape index: {}]   ;;  %s721_s5 = inlined_call_operand.vmem [shape: bf16[128,128], index: 5, kind: input, shape index: {}]   ;;  %s722_s6 = inlined_call_operand.vmem [shape: f32[1,128], index: 6, kind: input, shape index: {}]   ;;  %s723_s7 = inlined_call_operand.hbm [shape: f32[8,128], index: 7, kind: output, shape index: {}]  }
   0x1   :  { %v499_v0 = vld [vmem:[%s717_s1] sm:$0xff]   ;;  %436 = vmatprep.subr.bf16.mxu0 %v547_v1  ;;  %456 = vmatprep.subr.bf16.mxu1 %v547_v1  ;;  %v500_v2 = vld [vmem:[%s717_s1 + $0x8] sm:$0xff]   ;;  %v501_v3 = vld [vmem:[%s717_s1 + $0x10] sm:$0xff]  }
   0x2   :  { %437 = vmatpush3.bf16.msra.mxu0 %v499_v0  ;;  %452 = vmatprep.mubr.msk.bf16.mxu0 %vm548_vm0, %v547_v1  ;;  %v507_v4 = vld [vmem:[%s719_s3] sm:$0xff]   ;;  %v502_v5 = vld [vmem:[%s717_s1 + $0x18] sm:$0xff]   ;;  %v508_v6 = vld [vmem:[%s719_s3 + $0x8] sm:$0xff]  }
   0x3   :  { %438 = vmatprep.subr.bf16.mxu0 %v547_v1  ;;  %472 = vmatprep.mubr.msk.bf16.mxu1 %vm548_vm0, %v547_v1  ;;  %v503_v7 = vld [vmem:[%s717_s1 + $0x20] sm:$0xff]   ;;  %v509_v8 = vld [vmem:[%s719_s3 + $0x10] sm:$0xff]   ;;  %v504_v9 = vld [vmem:[%s717_s1 + $0x28] sm:$0xff]  }
   0x4   :  { %457 = vmatpush3.bf16.msra.mxu1 %v507_v4  ;;  %v510_v10 = vld [vmem:[%s719_s3 + $0x18] sm:$0xff]  }
   0x5   :  { %458 = vmatprep.subr.bf16.mxu1 %v547_v1 }
   0x6   :  { %439 = vmatpush3.bf16.msra.mxu0 %v500_v2 }
   0x7   :  { %440 = vmatprep.subr.bf16.mxu0 %v547_v1 }
   0x8   :  { %459 = vmatpush3.bf16.msra.mxu1 %v508_v6 }
   0x9   :  { %460 = vmatprep.subr.bf16.mxu1 %v547_v1 }
   0xa   :  { %441 = vmatpush3.bf16.msra.mxu0 %v501_v3 }
   0xb   :  { %442 = vmatprep.subr.bf16.mxu0 %v547_v1 }
   0xc   :  { %461 = vmatpush3.bf16.msra.mxu1 %v509_v8 }
   0xd   :  { %462 = vmatprep.subr.bf16.mxu1 %v547_v1 }
   0xe   :  { %443 = vmatpush3.bf16.msra.mxu0 %v502_v5 }
   0xf   :  { %444 = vmatprep.subr.bf16.mxu0 %v547_v1 }
  0x12   :  { %445 = vmatpush3.bf16.msra.mxu0 %v503_v7 }
  0x13   :  { %446 = vmatprep.subr.bf16.mxu0 %v547_v1 }
  0x14   :  { %12 = vsyncpa [#allocation3], 0  ;;  %v505_v11 = vld [vmem:[%s717_s1 + $0x30] sm:$0xff]   ;;  %463 = vmatpush3.bf16.msra.mxu1 %v510_v10  ;;  %v511_v12 = vld [vmem:[%s719_s3 + $0x20] sm:$0xff]   ;;  %s549_s30 = smov [#allocation2]  }
  0x15   :  { %464 = vmatprep.subr.bf16.mxu1 %v547_v1  ;;  %v506_v13 = vld [vmem:[%s717_s1 + $0x38] sm:$0xff]   ;;  %v512_v14 = vld [vmem:[%s719_s3 + $0x28] sm:$0xff]   ;;  %v28_v15 = vld [vmem:[%s716_s0] sm:$0xf] }
  0x16   :  { %447 = vmatpush3.bf16.msra.mxu0 %v504_v9  ;;  %v513_v16 = vld [vmem:[%s719_s3 + $0x30] sm:$0xff]   ;;  %v514_v17 = vld [vmem:[%s719_s3 + $0x38] sm:$0xff]   ;;  %v515_v18 = vld [vmem:[%s721_s5] sm:$0xff]  }
  0x17   :  { %448 = vmatprep.subr.bf16.mxu0 %v547_v1  ;;  %v516_v19 = vld [vmem:[%s721_s5 + $0x8] sm:$0xff]   ;;  %v517_v20 = vld [vmem:[%s721_s5 + $0x10] sm:$0xff]   ;;  %v518_v21 = vld [vmem:[%s721_s5 + $0x18] sm:$0xff]  }
  0x18   :  { %465 = vmatpush3.bf16.msra.mxu1 %v511_v12  ;;  %v519_v22 = vld [vmem:[%s721_s5 + $0x20] sm:$0xff]   ;;  %v520_v23 = vld [vmem:[%s721_s5 + $0x28] sm:$0xff]   ;;  %v521_v32 = vld [vmem:[%s721_s5 + $0x30] sm:$0xff]  }
  0x19   :  { %466 = vmatprep.subr.bf16.mxu1 %v547_v1  ;;  %v382_v24 = vld [vmem:[%s718_s2] ss:$0 sm:$0xff]  ;;  %v522_v33 = vld [vmem:[%s721_s5 + $0x38] sm:$0xff]   ;;  %s374_s5 = sshll.u32 %s549_s30, 4  ;;  %s375_s5 = int_to_ptr.vmem [resolvable:$true] %s374_s5 }
  0x1a   :  { %449 = vmatpush3.bf16.msra.mxu0 %v505_v11  ;;  %v391_v34 = vld [vmem:[%s720_s4] ss:$0 sm:$0xff]  ;;  %s523_s4 = scalar_lea.vmem %s375_s5, 128  ;;  %p528_p1 = scmp.lt.s32.totalorder %s375_s5, %s375_s5 }
  0x1b   :  { %450 = vmatprep.subr.bf16.mxu0 %v547_v1  ;;  %v400_v42 = vld [vmem:[%s722_s6] ss:$0 sm:$0xff]  ;;  %p524_p0 = scmp.ne.s32.totalorder %s375_s5, %s523_s4  ;;  %p529_p2 = scmp.lt.s32.totalorder %s523_s4, %s523_s4 }
  0x1c   :  { %467 = vmatpush3.bf16.msra.mxu1 %v512_v14 }
  0x1d   :  { %468 = vmatprep.subr.bf16.mxu1 %v547_v1  ;;  %p530_p3 = por %p529_p2, %p528_p1 }
  0x1e   :  { %451 = vmatpush3.bf16.msra.mxu0 %v506_v13 }
  0x1f   :  { %476 = vmatprep.subr.bf16.mxu0 %v547_v1  ;;  %p531_p4 = pnand %p530_p3, %p524_p0 }
  0x20   :  { %469 = vmatpush3.bf16.msra.mxu1 %v513_v16 }
  0x21   :  { %453 = vmatmul.mubr.bf16.vlgmr.msra.gmra.mrb[0].mxu0 %v28_v15  ;;  %470 = vmatprep.subr.bf16.mxu1 %v547_v1 }
  0x22   :  { %492 = vmatprep.mubr.msk.bf16.mxu0 %vm548_vm0, %v547_v1  ;;  %477 = vmatpush3.bf16.msra.mxu0 %v515_v18 }
  0x23   :  { %478 = vmatprep.subr.bf16.mxu0 %v547_v1 }
  0x24   :  { %471 = vmatpush3.bf16.msra.mxu1 %v514_v17 }
  0x26   :  { %479 = vmatpush3.bf16.msra.mxu0 %v516_v19 }
  0x27   :  { %480 = vmatprep.subr.bf16.mxu0 %v547_v1 }
  0x2a   :  { %481 = vmatpush3.bf16.msra.mxu0 %v517_v20 }
  0x2b   :  { %482 = vmatprep.subr.bf16.mxu0 %v547_v1 }
  0x2e   :  { %483 = vmatpush3.bf16.msra.mxu0 %v518_v21 }
  0x2f   :  { %484 = vmatprep.subr.bf16.mxu0 %v547_v1 }
  0x32   :  { %485 = vmatpush3.bf16.msra.mxu0 %v519_v22 }
  0x33   :  { %486 = vmatprep.subr.bf16.mxu0 %v547_v1 }
  0x36   :  { %487 = vmatpush3.bf16.msra.mxu0 %v520_v23 }
  0x37   :  { %488 = vmatprep.subr.bf16.mxu0 %v547_v1 }
  0x3a   :  { %489 = vmatpush3.bf16.msra.mxu0 %v521_v32 }
  0x3b   :  { %490 = vmatprep.subr.bf16.mxu0 %v547_v1 }
  0x3e   :  { %491 = vmatpush3.bf16.msra.mxu0 %v522_v33 }
  0xf4   :  { %v134_v25 = vpop.f32.mrb[0].mxu0 }
  0xf5   :  { %v135_v26 = vadd.f32 %v382_v24, %v134_v25  ;;  %v454_v27 = vpop.f32.mrb[1].mxu0 }
  0xf6   :  { %v137_v28 = vpop.f32.mrb[2].mxu0 }
  0xf7   :  { %v140_v29 = vmax.f32 %v135_v26, 0.0  ;;  %v455_v30 = vpop.f32.mrb[3].mxu0 }
  0xf9   :  { %v141_v31 = vpack.c.bf16 %v140_v29, %v140_v29 }
  0xfb   :  { %473 = vmatmul.mubr.bf16.vlgmr.msra.gmra.mrb[0].mxu1 %v141_v31 }
 0x1ce   :  { %v247_v35 = vpop.f32.mrb[0].mxu1 }
 0x1cf   :  { %v248_v36 = vadd.f32 %v391_v34, %v247_v35  ;;  %v474_v37 = vpop.f32.mrb[1].mxu1 }
 0x1d0   :  { %v250_v38 = vpop.f32.mrb[2].mxu1 }
 0x1d1   :  { %v253_v39 = vmax.f32 %v248_v36, 0.0  ;;  %v475_v40 = vpop.f32.mrb[3].mxu1 }
 0x1d3   :  { %v254_v41 = vpack.c.bf16 %v253_v39, %v253_v39 }
 0x1d5   :  { %493 = vmatmul.mubr.bf16.vlgmr.msra.gmra.mrb[4].mxu0 %v254_v41 }
 0x2a8   :  { %v360_v43 = vpop.f32.mrb[4].mxu0 }
 0x2a9   :  { %v361_v44 = vadd.f32 %v400_v42, %v360_v43  ;;  %v494_v45 = vpop.f32.mrb[5].mxu0 }
 0x2aa   :  { %v363_v46 = vpop.f32.mrb[6].mxu0 }
 0x2ab   :  { %v366_v47 = vmax.f32 %v361_v44, 0.0  ;;  %v495_v48 = vpop.f32.mrb[7].mxu0 }
 0x2ad   :  { %367 = vst [vmem:[#allocation2] sm:$0xff] %v366_v47 }
 0x2ae   :  { %534 = shalt.err (!%p531_p4)
}
 0x2af   :  { %s535_s6 = scalar_lea.hbm %s723_s7, 128 }
 0x2b0   :  { %p536_p5 = scmp.ne.s32.totalorder %s723_s7, %s535_s6  ;;  %p539_p6 = scmp.lt.u32.totalorder %s535_s6, %s723_s7 }
 0x2b2   :  { %p541_p7 = pnand %p539_p6, %p536_p5 }
 0x2b4   :  { %544 = shalt.err (!%p541_p7)
}
 0x2b5   :  { %377 = dma.vmem_to_hbm [thread:$0]  %s375_s5, 128, %s723_s7, [#allocation3]  }
 0x2b6   :  { %545 = dma.done.wait [#allocation3], 128  }
 0x2b7   :  { %546 = vsyncadd [#allocation3], 4294967168 }
 0x2b8   :  { %381 = vsyncpa [#allocation3], 1 }

</bundles_post_ra>
